<compile_context>
chip_gen: v6e
topology: v6e:2x2x1
jax: 0.10.0
libtpu: 0.0.40
codegen_flags: <defaults>
</compile_context>

<pallas_src>
import functools

import jax
import jax.numpy as jnp
from jax.experimental import pallas as pl
from jax.experimental.pallas import tpu as pltpu


def _round_up(n, m):
    return ((n + m - 1) // m) * m


def _linear_kernel(x_ref, w_ref, b_ref, o_ref):
    # x_ref : (TM, D)      f32   batch tile (cast to bf16 in-register below)
    # w_ref : (D, O_pad)   bf16  pre-transposed weight, VMEM-resident
    # b_ref : (1, O_pad)   f32   bias, VMEM-resident
    # o_ref : (TM, O)      f32   only the real output columns are written back
    x_bf = x_ref[...].astype(jnp.bfloat16)
    acc = jnp.dot(x_bf, w_ref[...], preferred_element_type=jnp.float32)
    out = acc + b_ref[...]
    o_ref[...] = out[:, : o_ref.shape[1]].astype(o_ref.dtype)


@functools.partial(jax.jit, static_argnames=("block_batch", "min_pallas_batch"))
def logistic_regression_forward(x, weight, bias, *, block_batch=2048,
                                min_pallas_batch=512):
    """x: (B, D) f32, weight: (O, D) f32 (PyTorch layout), bias: (O,) f32."""
    B, D = x.shape
    O = weight.shape[0]

    # Tiny batches are pure call/DMA latency: a fused XLA dot wins outright.
    if B <= min_pallas_batch:
        return x @ weight.T + bias

    # Lane-dense weight/bias: pad O up to a multiple of 128.
    O_pad = _round_up(max(O, 128), 128)

    # Batch tile: multiple of 16 sublanes (bf16-friendly), capped so the f32 x
    # double-buffer (+ f32 out buffers) stays well inside v7x's 64 MiB VMEM.
    TM = min(_round_up(block_batch, 16), _round_up(B, 16))
    B_pad = _round_up(B, TM)

    # x stays f32 (cast happens inside the kernel); pad rows only.
    x_p = jnp.pad(x, ((0, B_pad - B), (0, 0)))
    # One-time pad + transpose of the tiny weight -> (D, O_pad) bf16.
    w_t = jnp.pad(weight, ((0, O_pad - O), (0, 0))).T.astype(jnp.bfloat16)
    b_p = jnp.pad(bias, (0, O_pad - O)).astype(jnp.float32).reshape(1, O_pad)

    grid = (B_pad // TM,)

    cost = pl.CostEstimate(
        flops=2 * B_pad * D * O_pad,
        transcendentals=0,
        bytes_accessed=(B_pad * D * 4        # x (f32, streamed once)
                        + D * O_pad * 2      # weight (bf16, resident)
                        + O_pad * 4          # bias (f32)
                        + B_pad * O * 4),    # out (f32, narrow columns only)
    )

    out = pl.pallas_call(
        _linear_kernel,
        out_shape=jax.ShapeDtypeStruct((B_pad, O), jnp.float32),
        grid_spec=pltpu.PrefetchScalarGridSpec(
            num_scalar_prefetch=0,
            grid=grid,
            in_specs=[
                pl.BlockSpec((TM, D), lambda i: (i, 0)),      # x: tiled over batch
                pl.BlockSpec((D, O_pad), lambda i: (0, 0)),   # weight: resident
                pl.BlockSpec((1, O_pad), lambda i: (0, 0)),   # bias: resident
            ],
            out_specs=pl.BlockSpec((TM, O), lambda i: (i, 0)),
        ),
        compiler_params=pltpu.CompilerParams(
            dimension_semantics=("parallel",),
            # > 16 MiB v5e default, comfortably under v7x's 64 MiB physical.
            vmem_limit_bytes=48 << 20,
        ),
        cost_estimate=cost,
    )(x_p, w_t, b_p)

    return out[:B]


if __name__ == "__main__":
    # MNIST-like sizes: input_size = 28*28 = 784, output_size = 10
    input_size = 28 * 28
    output_size = 10
    batch = 8

    key = jax.random.PRNGKey(0)
    kx, kw, kb = jax.random.split(key, 3)

    # Deterministic parameter init mimicking nn.Linear: U(-1/sqrt(D), 1/sqrt(D))
    bound = 1.0 / jnp.sqrt(jnp.float32(input_size))
    weight = jax.random.uniform(kw, (output_size, input_size), jnp.float32,
                                minval=-bound, maxval=bound)
    bias = jax.random.uniform(kb, (output_size,), jnp.float32,
                              minval=-bound, maxval=bound)
    x = jax.random.uniform(kx, (batch, input_size), jnp.float32)

    # Reference with the same bf16 input rounding, f32 accumulation.
    w_b = weight.astype(jnp.bfloat16).astype(jnp.float32)

    # Force the Pallas path even at this tiny batch so the kernel is exercised.
    out = logistic_regression_forward(x, weight, bias,
                                      block_batch=256, min_pallas_batch=0)
    out = jax.block_until_ready(out)
    ref = x.astype(jnp.bfloat16).astype(jnp.float32) @ w_b.T + bias
    assert out.shape == (batch, output_size)
    assert jnp.allclose(out, ref, atol=1e-3, rtol=1e-3), (
        f"max abs err {jnp.max(jnp.abs(out - ref))}")

    # Second check: unaligned batch (row padding) + multi-step grid.
    batch2 = 200
    x2 = jax.random.uniform(jax.random.PRNGKey(1), (batch2, input_size),
                            jnp.float32)
    out2 = jax.block_until_ready(
        logistic_regression_forward(x2, weight, bias,
                                    block_batch=64, min_pallas_batch=0))
    ref2 = x2.astype(jnp.bfloat16).astype(jnp.float32) @ w_b.T + bias
    assert out2.shape == (batch2, output_size)
    assert jnp.allclose(out2, ref2, atol=1e-3, rtol=1e-3), (
        f"max abs err {jnp.max(jnp.abs(out2 - ref2))}")

    print("KERNEL_OK")
</pallas_src>

<mosaic_0001>
module attributes {stable_mosaic.version = 11 : i64} {
  func.func @_linear_kernel(%arg0: i32, %arg1: memref<16x784xf32, #tpu.memory_space<vmem>>, %arg2: memref<784x128xbf16, #tpu.memory_space<vmem>>, %arg3: memref<1x128xf32, #tpu.memory_space<vmem>>, %arg4: memref<16x10xf32, #tpu.memory_space<vmem>>) attributes {dimension_semantics = [#tpu.dimension_semantics<parallel>], iteration_bounds = array<i64: 1>, scalar_prefetch = 0 : i64, scratch_operands = 0 : i64, tpu.core_type = #tpu.core_type<tc>, window_params = [{transform_indices = @transform_0, window_bounds = array<i64: 16, 784>}, {pipeline_mode = #tpu.pipeline_mode<synchronous>, transform_indices = @transform_1, window_bounds = array<i64: 784, 128>}, {pipeline_mode = #tpu.pipeline_mode<synchronous>, transform_indices = @transform_2, window_bounds = array<i64: 1, 128>}, {transform_indices = @transform_3, window_bounds = array<i64: 16, 10>}]} {
    %c0 = arith.constant 0 : index
    %c0_0 = arith.constant 0 : index
    %0 = vector.load %arg1[%c0, %c0_0] : memref<16x784xf32, #tpu.memory_space<vmem>>, vector<16x784xf32>
    %1 = arith.truncf %0 : vector<16x784xf32> to vector<16x784xbf16>
    %c0_1 = arith.constant 0 : index
    %c0_2 = arith.constant 0 : index
    %2 = vector.load %arg2[%c0_1, %c0_2] : memref<784x128xbf16, #tpu.memory_space<vmem>>, vector<784x128xbf16>
    %cst = arith.constant dense<0.000000e+00> : vector<16x128xf32>
    %3 = tpu.matmul %1, %2, %cst {dimension_numbers = #tpu.dot_dimension_numbers<[1], [0], [0], [1], [0, 0, 1, 1], [], []>} : vector<16x784xbf16>, vector<784x128xbf16>, vector<16x128xf32> -> vector<16x128xf32>
    %c0_3 = arith.constant 0 : index
    %c0_4 = arith.constant 0 : index
    %4 = vector.load %arg3[%c0_3, %c0_4] : memref<1x128xf32, #tpu.memory_space<vmem>>, vector<1x128xf32>
    %5 = vector.broadcast %4 : vector<1x128xf32> to vector<16x128xf32>
    %6 = arith.addf %3, %5 : vector<16x128xf32>
    %7 = vector.extract_strided_slice %6 {offsets = [0, 0], sizes = [16, 10], strides = [1, 1]} : vector<16x128xf32> to vector<16x10xf32>
    %c0_5 = arith.constant 0 : index
    %c0_6 = arith.constant 0 : index
    %8 = vector.load %arg4[%c0_5, %c0_6] : memref<16x10xf32, #tpu.memory_space<vmem>>, vector<16x10xf32>
    tpu.vector_store %arg4[%c0_5, %c0_6], %7 {strides = array<i32>} : memref<16x10xf32, #tpu.memory_space<vmem>>, vector<16x10xf32>,
    return
  }
  func.func @transform_0(%arg0: i32) -> (i32, i32) {
    %c0_i32 = arith.constant 0 : i32
    %c0_i32_0 = arith.constant 0 : i32
    return %arg0, %c0_i32 : i32, i32
  }
  func.func @transform_1(%arg0: i32) -> (i32, i32) {
    %c0_i32 = arith.constant 0 : i32
    %c0_i32_0 = arith.constant 0 : i32
    %c0_i32_1 = arith.constant 0 : i32
    return %c0_i32, %c0_i32_0 : i32, i32
  }
  func.func @transform_2(%arg0: i32) -> (i32, i32) {
    %c0_i32 = arith.constant 0 : i32
    %c0_i32_0 = arith.constant 0 : i32
    %c0_i32_1 = arith.constant 0 : i32
    return %c0_i32, %c0_i32_0 : i32, i32
  }
  func.func @transform_3(%arg0: i32) -> (i32, i32) {
    %c0_i32 = arith.constant 0 : i32
    %c0_i32_0 = arith.constant 0 : i32
    return %arg0, %c0_i32 : i32, i32
  }
}

</mosaic_0001>

<bundles_post_ra>
// kernel: logistic_regression_forward.1
= control target key start
LH: loop header
LB: loop body
LE: loop exit
PB: predicated region body
PF: predicated region fallthrough
CT: control target
= control target key end

     0   :  { %v786_v43 = vmov 0.0   ;;  %vm787_vm0 = vmmov 0   ;;  %vm435_vm1 = vcmask 130048   ;;  %vm603_vm2 = vcmask 80896   ;;  %s1006_s1 = inlined_call_operand.vmem [shape: bf16[784,128], index: 1, kind: input, shape index: {}]   ;;  %s1007_s0 = inlined_call_operand.vmem [shape: f32[16,784], index: 0, kind: input, shape index: {}]   ;;  %s1008_s2 = inlined_call_operand.vmem [shape: f32[1,128], index: 2, kind: input, shape index: {}]   ;;  %s1009_s3 = inlined_call_operand.vmem [shape: f32[16,10], index: 3, kind: output, shape index: {}]  }
   0x1   :  { %v737_v0 = vld [vmem:[%s1006_s1 + $0x78] sm:$0xff]   ;;  %v741_v4 = vld [vmem:[%s1006_s1 + $0x70] sm:$0xff]   ;;  %v745_v8 = vld [vmem:[%s1006_s1 + $0x68] sm:$0xff]  }
   0x2   :  { %v738_v1 = vld [vmem:[%s1006_s1 + $0x38] sm:$0xff]   ;;  %661 = vmatprep.subr.bf16.mxu0 %v737_v0  ;;  %v742_v5 = vld [vmem:[%s1006_s1 + $0x30] sm:$0xff]   ;;  %v746_v9 = vld [vmem:[%s1006_s1 + $0x28] sm:$0xff]  }
   0x3   :  { %v739_v2 = vld [vmem:[%s1006_s1 + $0xf8] sm:$0xff]   ;;  %662 = vmatpush3.bf16.msra.mxu0 %v738_v1  ;;  %v743_v6 = vld [vmem:[%s1006_s1 + $0xf0] sm:$0xff]   ;;  %v747_v10 = vld [vmem:[%s1006_s1 + $0xe8] sm:$0xff]  }
   0x4   :  { %v740_v3 = vld [vmem:[%s1006_s1 + $0xb8] sm:$0xff]   ;;  %683 = vmatprep.subr.bf16.mxu1 %v739_v2  ;;  %663 = vmatprep.subr.bf16.mxu0 %v741_v4  ;;  %v744_v7 = vld [vmem:[%s1006_s1 + $0xb0] sm:$0xff]   ;;  %v748_v11 = vld [vmem:[%s1006_s1 + $0xa8] sm:$0xff]  }
   0x5   :  { %684 = vmatpush3.bf16.msra.mxu1 %v740_v3  ;;  %v749_v12 = vld [vmem:[%s1006_s1 + $0x60] sm:$0xff]   ;;  %v753_v16 = vld [vmem:[%s1006_s1 + $0x58] sm:$0xff]   ;;  %v757_v20 = vld [vmem:[%s1006_s1 + $0x50] sm:$0xff]  }
   0x6   :  { %685 = vmatprep.subr.bf16.mxu1 %v743_v6  ;;  %v750_v13 = vld [vmem:[%s1006_s1 + $0x20] sm:$0xff]   ;;  %v754_v17 = vld [vmem:[%s1006_s1 + $0x18] sm:$0xff]   ;;  %v758_v21 = vld [vmem:[%s1006_s1 + $0x10] sm:$0xff]  }
   0x7   :  { %664 = vmatpush3.bf16.msra.mxu0 %v742_v5  ;;  %v751_v14 = vld [vmem:[%s1006_s1 + $0xe0] sm:$0xff]   ;;  %v755_v18 = vld [vmem:[%s1006_s1 + $0xd8] sm:$0xff]   ;;  %v759_v22 = vld [vmem:[%s1006_s1 + $0xd0] sm:$0xff]  }
   0x8   :  { %665 = vmatprep.subr.bf16.mxu0 %v745_v8  ;;  %v752_v15 = vld [vmem:[%s1006_s1 + $0xa0] sm:$0xff]   ;;  %v756_v19 = vld [vmem:[%s1006_s1 + $0x98] sm:$0xff]   ;;  %v760_v23 = vld [vmem:[%s1006_s1 + $0x90] sm:$0xff]  }
   0x9   :  { %686 = vmatpush3.bf16.msra.mxu1 %v744_v7  ;;  %v761_v24 = vld [vmem:[%s1006_s1 + $0x48] sm:$0xff]   ;;  %v765_v28 = vld [vmem:[%s1006_s1 + $0x40] sm:$0xff]   ;;  %v22_v36 = vld [vmem:[%s1007_s0 + $0x38] sm:$0xff] }
   0xa   :  { %687 = vmatprep.subr.bf16.mxu1 %v747_v10  ;;  %v762_v25 = vld [vmem:[%s1006_s1 + $0x8] sm:$0xff]   ;;  %v766_v29 = vld [vmem:[%s1006_s1] sm:$0xff]   ;;  %v769_v38 = vld [vmem:[%s1006_s1 + $0x178] sm:$0xff]  }
   0xb   :  { %666 = vmatpush3.bf16.msra.mxu0 %v746_v9  ;;  %v763_v26 = vld [vmem:[%s1006_s1 + $0xc8] sm:$0xff]   ;;  %v767_v30 = vld [vmem:[%s1006_s1 + $0xc0] sm:$0xff]   ;;  %v18_v39 = vld [vmem:[%s1007_s0 + $0x18] sm:$0xff] }
   0xc   :  { %667 = vmatprep.subr.bf16.mxu0 %v749_v12  ;;  %v764_v27 = vld [vmem:[%s1006_s1 + $0x88] sm:$0xff]   ;;  %v23_v32 = vld [vmem:[%s1007_s0 + $0x40] sm:$0xff]  ;;  %v25_v40 = vld [vmem:[%s1007_s0 + $0x50] sm:$0xff] }
   0xd   :  { %688 = vmatpush3.bf16.msra.mxu1 %v748_v11  ;;  %v16_v31 = vld [vmem:[%s1007_s0 + $0x8] sm:$0xff]  ;;  %v768_v34 = vld [vmem:[%s1006_s1 + $0x80] sm:$0xff]   ;;  %v32_v41 = vpack.c.bf16 %v25_v40, %v18_v39  ;;  %v770_v42 = vld [vmem:[%s1006_s1 + $0x138] sm:$0xff]  }
   0xe   :  { %689 = vmatprep.subr.bf16.mxu1 %v751_v14  ;;  %v30_v33 = vpack.c.bf16 %v23_v32, %v16_v31  ;;  %v15_v35 = vld [vmem:[%s1007_s0] sm:$0xff]  ;;  %v17_v44 = vld [vmem:[%s1007_s0 + $0x10] sm:$0xff]  ;;  %v24_v45 = vld [vmem:[%s1007_s0 + $0x48] sm:$0xff] }
   0xf   :  { %668 = vmatpush3.bf16.msra.mxu0 %v750_v13  ;;  %v29_v37 = vpack.c.bf16 %v22_v36, %v15_v35  ;;  %512 = vmatprep.mubr.bf16.mxu1 %v32_v41  ;;  %v31_v46 = vpack.c.bf16 %v24_v45, %v17_v44  ;;  %v771_v47 = vld [vmem:[%s1006_s1 + $0x170] sm:$0xff]   ;;  %v773_v49 = vld [vmem:[%s1006_s1 + $0x168] sm:$0xff]   ;;  %v775_v51 = vld [vmem:[%s1006_s1 + $0x160] sm:$0xff]  }
  0x10   :  { %669 = vmatprep.subr.bf16.mxu0 %v753_v16  ;;  %471 = vmatprep.mubr.bf16.mxu0 %v30_v33  ;;  %v772_v48 = vld [vmem:[%s1006_s1 + $0x130] sm:$0xff]   ;;  %v774_v50 = vld [vmem:[%s1006_s1 + $0x128] sm:$0xff]   ;;  %v776_v52 = vld [vmem:[%s1006_s1 + $0x120] sm:$0xff]  }
  0x11   :  { %690 = vmatpush3.bf16.msra.mxu1 %v752_v15  ;;  %v777_v53 = vld [vmem:[%s1006_s1 + $0x158] sm:$0xff]   ;;  %v779_v55 = vld [vmem:[%s1006_s1 + $0x150] sm:$0xff]   ;;  %v785_v56 = vld [vmem:[%s1006_s1 + $0x180] sm:$0xff]  }
  0x12   :  { %691 = vmatprep.subr.bf16.mxu1 %v755_v18  ;;  %v778_v54 = vld [vmem:[%s1006_s1 + $0x118] sm:$0xff]   ;;  %v20_v57 = vld [vmem:[%s1007_s0 + $0x28] sm:$0xff]  ;;  %v27_v58 = vld [vmem:[%s1007_s0 + $0x60] sm:$0xff] }
  0x13   :  { %670 = vmatpush3.bf16.msra.mxu0 %v754_v17  ;;  %v780_v59 = vld [vmem:[%s1006_s1 + $0x110] sm:$0xff]   ;;  %v34_v60 = vpack.c.bf16 %v27_v58, %v20_v57  ;;  %v28_v62 = vld [vmem:[%s1007_s0 + $0x68] sm:$0xff]  ;;  %v783_v2 = vld [vmem:[%s1006_s1 + $0x140] sm:$0xff]  }
  0x14   :  { %671 = vmatprep.subr.bf16.mxu0 %v757_v20  ;;  %v21_v61 = vld [vmem:[%s1007_s0 + $0x30] sm:$0xff]  ;;  %v781_v63 = vld [vmem:[%s1006_s1 + $0x148] sm:$0xff]   ;;  %v784_v3 = vld [vmem:[%s1006_s1 + $0x100] sm:$0xff]  }
  0x15   :  { %692 = vmatpush3.bf16.msra.mxu1 %v756_v19  ;;  %v35_v0 = vpack.c.bf16 %v28_v62, %v21_v61  ;;  %v782_v1 = vld [vmem:[%s1006_s1 + $0x108] sm:$0xff]   ;;  %v19_v4 = vld [vmem:[%s1007_s0 + $0x20] sm:$0xff]  ;;  %v26_v5 = vld [vmem:[%s1007_s0 + $0x58] sm:$0xff] }
  0x16   :  { %693 = vmatprep.subr.bf16.mxu1 %v759_v22  ;;  %v33_v6 = vpack.c.bf16 %v26_v5, %v19_v4  ;;  %v610_v19 = vld [vmem:[%s1008_s2] ss:$0 sm:$0xff] }
  0x17   :  { %672 = vmatpush3.bf16.msra.mxu0 %v758_v21 }
  0x18   :  { %673 = vmatprep.subr.bf16.mxu0 %v761_v24 }
  0x19   :  { %694 = vmatpush3.bf16.msra.mxu1 %v760_v23 }
  0x1a   :  { %695 = vmatprep.subr.bf16.mxu1 %v763_v26 }
  0x1b   :  { %674 = vmatpush3.bf16.msra.mxu0 %v762_v25 }
  0x1c   :  { %675 = vmatprep.subr.bf16.mxu0 %v765_v28 }
  0x1d   :  { %696 = vmatpush3.bf16.msra.mxu1 %v764_v27 }
  0x1e   :  { %697 = vmatprep.subr.bf16.mxu1 %v767_v30 }
  0x1f   :  { %676 = vmatpush3.bf16.msra.mxu0 %v766_v29 }
  0x20   :  { %705 = vmatprep.subr.bf16.mxu0 %v769_v38 }
  0x21   :  { %698 = vmatpush3.bf16.msra.mxu1 %v768_v34 }
  0x22   :  { %729 = vmatprep.subr.bf16.mxu1 %v786_v43  ;;  %472 = vmatmul.mubr.bf16.vlgmr.msra.gmra.mxu0 %v29_v37 }
  0x23   :  { %706 = vmatpush3.bf16.msra.mxu0 %v770_v42  ;;  %553 = vmatprep.mubr.bf16.mxu0 %v34_v60 }
  0x24   :  { %513 = vmatmul.mubr.bf16.vlgmr.msra.gmra.mxu1 %v31_v46  ;;  %707 = vmatprep.subr.bf16.mxu0 %v771_v47 }
  0x25   :  { %731 = vmatprep.mubr.msk.bf16.mxu1 %vm787_vm0, %v786_v43  ;;  %730 = vmatpush3.bf16.msra.mxu1 %v785_v56 }
  0x27   :  { %708 = vmatpush3.bf16.msra.mxu0 %v772_v48 }
  0x28   :  { %709 = vmatprep.subr.bf16.mxu0 %v773_v49 }
  0x2b   :  { %710 = vmatpush3.bf16.msra.mxu0 %v774_v50 }
  0x2c   :  { %711 = vmatprep.subr.bf16.mxu0 %v775_v51  ;;  %732 = vmatmul.mubr.msk.bf16.vlgmr.msra.gmra.mxu1 %vm435_vm1, %v35_v0 }
  0x2f   :  { %712 = vmatpush3.bf16.msra.mxu0 %v776_v52 }
  0x30   :  { %713 = vmatprep.subr.bf16.mxu0 %v777_v53 }
  0x33   :  { %714 = vmatpush3.bf16.msra.mxu0 %v778_v54 }
  0x34   :  { %715 = vmatprep.subr.bf16.mxu0 %v779_v55 }
  0x37   :  { %716 = vmatpush3.bf16.msra.mxu0 %v780_v59 }
  0x38   :  { %717 = vmatprep.subr.bf16.mxu0 %v781_v63 }
  0x3b   :  { %718 = vmatpush3.bf16.msra.mxu0 %v782_v1 }
  0x3c   :  { %719 = vmatprep.subr.bf16.mxu0 %v783_v2 }
  0x3f   :  { %720 = vmatpush3.bf16.msra.mxu0 %v784_v3 }
  0x42   :  { %554 = vmatmul.mubr.bf16.vlgmr.msra.gmra.mxu0 %v33_v6 }
  0xe2   :  { %v677_v10 = vpop.f32.mrf.mxu0 }
  0xe4   :  { %v699_v7 = vpop.f32.mrf.mxu1  ;;  %v678_v12 = vpop.f32.mrf.mxu0 }
  0xe5   :  { %v679_v18 = vadd.f32 %v678_v12, %v677_v10 }
  0xe6   :  { %v700_v8 = vpop.f32.mrf.mxu1  ;;  %v680_v15 = vpop.f32.mrf.mxu0 }
  0xe7   :  { %v474_v21 = vadd.f32 %v679_v18, %v610_v19  ;;  %v701_v22 = vadd.f32 %v700_v8, %v699_v7 }
  0xe8   :  { %v702_v9 = vpop.f32.mrf.mxu1  ;;  %v681_v20 = vpop.f32.mrf.mxu0 }
  0xe9   :  { %v682_v23 = vadd.f32 %v681_v20, %v680_v15  ;;  %v515_v26 = vadd.f32 %v701_v22, %v474_v21 }
  0xea   :  { %v703_v11 = vpop.f32.mrf.mxu1 }
  0xeb   :  { %v477_v27 = vadd.f32 %v682_v23, %v610_v19  ;;  %v704_v28 = vadd.f32 %v703_v11, %v702_v9 }
  0xec   :  { %v596_v13 = vpop.f32.mrf.mxu1 }
  0xed   :  { %v518_v33 = vadd.f32 %v704_v28, %v477_v27 }
  0xee   :  { %v733_v14 = vpop.f32.mrf.mxu1 }
  0xf0   :  { %v599_v16 = vpop.f32.mrf.mxu1 }
  0xf2   :  { %v734_v17 = vpop.f32.mrf.mxu1 }
 0x102   :  { %v721_v24 = vpop.f32.mrf.mxu0 }
 0x104   :  { %v722_v25 = vpop.f32.mrf.mxu0 }
 0x105   :  { %v723_v29 = vadd.f32 %v722_v25, %v721_v24 }
 0x106   :  { %v724_v30 = vpop.f32.mrf.mxu0 }
 0x107   :  { %v556_v31 = vadd.f32 %v723_v29, %v515_v26 }
 0x108   :  { %v725_v32 = vpop.f32.mrf.mxu0 }
 0x109   :  { %v597_v34 = vadd.f32 %v596_v13, %v556_v31  ;;  %v726_v35 = vadd.f32 %v725_v32, %v724_v30 }
 0x10b   :  { %604 = vst.msk [vmem:[%s1009_s3] sm:$0xff] %vm603_vm2, %v597_v34  ;;  %v559_v36 = vadd.f32 %v726_v35, %v518_v33 }
 0x10d   :  { %v600_v37 = vadd.f32 %v599_v16, %v559_v36 }
 0x10f   :  { %605 = vst.msk [vmem:[%s1009_s3 + $0x8] sm:$0xff] %vm603_vm2, %v600_v37 }

</bundles_post_ra>
